<compile_context>
chip_gen: v5e
topology: v5e:2x2
jax: 0.10.0
libtpu: 0.0.40
codegen_flags: <defaults>
</compile_context>

<pallas_src>
import functools

import numpy as np
import jax
import jax.numpy as jnp
from jax import lax
from jax.experimental import pallas as pl
from jax.experimental.pallas import tpu as pltpu

TAU = 10.0
EPS = 1e-6


def _loss_kernel(logits_ref, targets_ref, out_ref, *, tau):
    """One grid step: TB images -> (TB, 2) = [sum(exp(tau*p)*mask), sum(mask)]."""
    TB, H, W = targets_ref.shape  # channel dim already squeezed by the BlockSpec

    t = targets_ref[...].astype(jnp.float32)        # (TB, H, W)
    logits = logits_ref[...].astype(jnp.float32)    # (TB, H, W)

    # Edge-validity masks: computed once, broadcast over the TB slab.
    row = lax.broadcasted_iota(jnp.int32, (1, H, W), 1)
    col = lax.broadcasted_iota(jnp.int32, (1, H, W), 2)
    not_top = (row > 0).astype(jnp.float32)
    not_bot = (row < H - 1).astype(jnp.float32)
    not_left = (col > 0).astype(jnp.float32)
    not_right = (col < W - 1).astype(jnp.float32)

    # Separable 3x3 max-pool dilation (stride 1, pad 1), vectorized over TB.
    # NOTE: zero-fill (mask-multiplied) padding is equivalent to F.max_pool2d's
    # -inf padding *only* because we consume solely the (dilated > 0.5) threshold
    # and the center tap is always in-bounds; do not reuse `dilated` values raw.
    up = pltpu.roll(t, shift=1, axis=1) * not_top          # t[:, i-1, j]
    down = pltpu.roll(t, shift=H - 1, axis=1) * not_bot    # t[:, i+1, j]
    vmax = jnp.maximum(t, jnp.maximum(up, down))
    left = pltpu.roll(vmax, shift=1, axis=2) * not_left    # v[:, i, j-1]
    right = pltpu.roll(vmax, shift=W - 1, axis=2) * not_right
    dilated = jnp.maximum(vmax, jnp.maximum(left, right))

    mask = (dilated > 0.5).astype(jnp.float32)

    # exp(tau * sigmoid(x)) = exp(tau/2) * exp((tau/2) * tanh(x/2))
    # -> 2 EUP ops (tanh, exp) instead of 3 (sigmoid's exp + recip, outer exp).
    half_tau = tau * 0.5
    e = (jnp.exp(half_tau * jnp.tanh(0.5 * logits)) * float(np.exp(half_tau))) * mask

    # Lane reduction first, then sublane reduction -> (TB, 1) each; single fused
    # (TB, 2) store per grid step.
    se = jnp.sum(jnp.sum(e, axis=2, keepdims=True), axis=1)       # (TB, 1)
    ms = jnp.sum(jnp.sum(mask, axis=2, keepdims=True), axis=1)    # (TB, 1)
    out_ref[0] = jnp.concatenate([se, ms], axis=1)                # (TB, 2)


def _vmem_capacity_bytes():
    """Physical VMEM of the current generation (128 MiB v5e/v6e, 64 MiB v7x)."""
    try:
        cap = getattr(pltpu.get_tpu_info(), "vmem_capacity_bytes", None)
        if cap:
            return int(cap)
    except Exception:
        pass
    return 64 << 20  # conservative fallback (v7x per-TC VMEM)


def _pick_tb(B, H, W, in_itemsize, vmem_cap):
    """Largest batch tile (<= 8, divides B) that fits VMEM and keeps G >= 2."""
    # Per-image residency: double-buffered inputs + ~8 live f32 temporaries.
    per_batch = H * W * (2 * in_itemsize + 8 * 4)
    budget = (vmem_cap * 3) // 4  # headroom for compiler scratch / outputs
    tb = int(max(1, min(B, 8, budget // max(per_batch, 1))))
    if B >= 2:
        # Keep G = B // TB >= 2 so the 'parallel' grid axis feeds both v7x TCs.
        tb = min(tb, max(1, B // 2))
    while B % tb:
        tb -= 1
    return tb


def at_least_one_match_loss(outputs, targets, tau=TAU, epsilon=EPS):
    """outputs: (B, 1, H, W) logits; targets: (B, H, W) or (B, C, H, W).

    Narrow dtypes (bf16 logits, int8/bool targets) are streamed as-is; the f32
    cast happens in-kernel on the VMEM tile.
    """
    B, _, H, W = outputs.shape
    o_item = jnp.dtype(outputs.dtype).itemsize
    t_item = jnp.dtype(targets.dtype).itemsize
    vmem_cap = _vmem_capacity_bytes()
    TB = _pick_tb(B, H, W, o_item + t_item, vmem_cap)
    G = B // TB

    logits_spec = pl.BlockSpec((TB, pl.Squeezed(), H, W),
                               lambda b: (b, 0, 0, 0))
    if targets.ndim == 3:
        tgt_spec = pl.BlockSpec((TB, H, W), lambda b: (b, 0, 0))
    elif targets.ndim == 4:
        # Channel 0 is used, matching the PyTorch module's targets[:, 0:1, ...].
        tgt_spec = pl.BlockSpec((TB, pl.Squeezed(), H, W),
                                lambda b: (b, 0, 0, 0))
    else:
        raise ValueError("targets must be (B, H, W) or (B, C, H, W)")

    out_spec = pl.BlockSpec((1, TB, 2), lambda b: (b, 0, 0))

    # Per-step working set: 2 pipeline buffers per input + f32 temporaries + out.
    step_bytes = (2 * TB * H * W * (o_item + t_item)
                  + 8 * TB * H * W * 4
                  + 2 * TB * 2 * 4)
    vmem_limit = int(min(vmem_cap, max(2 * step_bytes, 16 << 20)))

    cost = pl.CostEstimate(
        flops=15 * B * H * W,
        transcendentals=2 * B * H * W,
        bytes_accessed=B * H * W * (o_item + t_item) + B * 2 * 4,
    )

    out = pl.pallas_call(
        functools.partial(_loss_kernel, tau=float(tau)),
        out_shape=jax.ShapeDtypeStruct((G, TB, 2), jnp.float32),
        grid=(G,),
        in_specs=[logits_spec, tgt_spec],
        out_specs=out_spec,
        compiler_params=pltpu.CompilerParams(
            dimension_semantics=("parallel",),
            vmem_limit_bytes=vmem_limit),
        cost_estimate=cost,
    )(outputs, targets)

    out = out.reshape(B, 2)
    sum_exp = out[:, 0]
    mask_sum = out[:, 1]

    smooth_max = jnp.log(sum_exp + epsilon) / tau
    smooth_max = jnp.where(mask_sum > 0, smooth_max, jnp.zeros_like(smooth_max))
    loss = -jnp.log(smooth_max + epsilon)

    valid = mask_sum > 0
    n_valid = jnp.sum(valid.astype(jnp.float32))
    mean_valid = jnp.sum(jnp.where(valid, loss, 0.0)) / jnp.maximum(n_valid, 1.0)
    return jnp.where(n_valid > 0, mean_valid, jnp.mean(loss))


def _reference_loss(outputs, targets, tau=TAU, epsilon=EPS):
    """Pure-JAX reference mirroring the PyTorch module exactly."""
    p = jax.nn.sigmoid(outputs[:, 0, :, :].astype(jnp.float32))
    t = targets.astype(jnp.float32)
    if t.ndim == 4:
        t = t[:, 0, :, :]
    dil = lax.reduce_window(t, -jnp.inf, lax.max,
                            window_dimensions=(1, 3, 3),
                            window_strides=(1, 1, 1),
                            padding=((0, 0), (1, 1), (1, 1)))
    mask = (dil > 0.5).astype(jnp.float32)
    mask_sum = jnp.sum(mask, axis=(1, 2))
    smooth_max = jnp.log(jnp.sum(jnp.exp(tau * p) * mask, axis=(1, 2)) + epsilon) / tau
    smooth_max = jnp.where(mask_sum > 0, smooth_max, 0.0)
    loss = -jnp.log(smooth_max + epsilon)
    valid = mask_sum > 0
    n_valid = jnp.sum(valid.astype(jnp.float32))
    mean_valid = jnp.sum(jnp.where(valid, loss, 0.0)) / jnp.maximum(n_valid, 1.0)
    return jnp.where(n_valid > 0, mean_valid, jnp.mean(loss))


if __name__ == "__main__":
    B, H, W = 2, 16, 16
    key = jax.random.PRNGKey(0)
    k1, k2 = jax.random.split(key)

    outputs = jax.random.normal(k1, (B, 1, H, W), dtype=jnp.float32)      # logits
    targets = (jax.random.uniform(k2, (B, 1, H, W)) > 0.9).astype(jnp.float32)
    # Make batch 1 all-zero to exercise the mask_sum == 0 path.
    targets = targets.at[1].set(0.0)

    loss = jax.block_until_ready(at_least_one_match_loss(outputs, targets))
    ref = jax.block_until_ready(_reference_loss(outputs, targets))
    np.testing.assert_allclose(np.asarray(loss), np.asarray(ref), rtol=2e-3, atol=2e-5)

    print("KERNEL_OK")
</pallas_src>

<mosaic_0001>
module attributes {stable_mosaic.version = 11 : i64} {
  func.func @_loss_kernel(%arg0: i32, %arg1: memref<1x1x16x16xf32, #tpu.memory_space<vmem>>, %arg2: memref<1x1x16x16xf32, #tpu.memory_space<vmem>>, %arg3: memref<1x1x2xf32, #tpu.memory_space<vmem>>) attributes {dimension_semantics = [#tpu.dimension_semantics<parallel>], iteration_bounds = array<i64: 2>, scalar_prefetch = 0 : i64, scratch_operands = 0 : i64, tpu.core_type = #tpu.core_type<tc>, window_params = [{transform_indices = @transform_0, window_bounds = array<i64: 1, 1, 16, 16>}, {transform_indices = @transform_1, window_bounds = array<i64: 1, 1, 16, 16>}, {transform_indices = @transform_2, window_bounds = array<i64: 1, 1, 2>}]} {
    %c0 = arith.constant 0 : index
    %c0_0 = arith.constant 0 : index
    %c0_1 = arith.constant 0 : index
    %c0_2 = arith.constant 0 : index
    %0 = vector.load %arg2[%c0, %c0_0, %c0_1, %c0_2] : memref<1x1x16x16xf32, #tpu.memory_space<vmem>>, vector<1x1x16x16xf32>
    %1 = vector.shape_cast %0 : vector<1x1x16x16xf32> to vector<1x16x16xf32>
    %c0_3 = arith.constant 0 : index
    %c0_4 = arith.constant 0 : index
    %c0_5 = arith.constant 0 : index
    %c0_6 = arith.constant 0 : index
    %2 = vector.load %arg1[%c0_3, %c0_4, %c0_5, %c0_6] : memref<1x1x16x16xf32, #tpu.memory_space<vmem>>, vector<1x1x16x16xf32>
    %3 = vector.shape_cast %2 : vector<1x1x16x16xf32> to vector<1x16x16xf32>
    %4 = tpu.iota {dimensions = array<i32: 1>} : vector<1x16x16xi32>
    %5 = tpu.iota {dimensions = array<i32: 2>} : vector<1x16x16xi32>
    %c0_i32 = arith.constant 0 : i32
    %6 = vector.broadcast %c0_i32 : i32 to vector<1x16x16xi32>
    %7 = arith.cmpi sgt, %4, %6 : vector<1x16x16xi32>
    %8 = arith.extui %7 : vector<1x16x16xi1> to vector<1x16x16xi32>
    %9 = arith.sitofp %8 : vector<1x16x16xi32> to vector<1x16x16xf32>
    %c15_i32 = arith.constant 15 : i32
    %10 = vector.broadcast %c15_i32 : i32 to vector<1x16x16xi32>
    %11 = arith.cmpi slt, %4, %10 : vector<1x16x16xi32>
    %12 = arith.extui %11 : vector<1x16x16xi1> to vector<1x16x16xi32>
    %13 = arith.sitofp %12 : vector<1x16x16xi32> to vector<1x16x16xf32>
    %c0_i32_7 = arith.constant 0 : i32
    %14 = vector.broadcast %c0_i32_7 : i32 to vector<1x16x16xi32>
    %15 = arith.cmpi sgt, %5, %14 : vector<1x16x16xi32>
    %16 = arith.extui %15 : vector<1x16x16xi1> to vector<1x16x16xi32>
    %17 = arith.sitofp %16 : vector<1x16x16xi32> to vector<1x16x16xf32>
    %c15_i32_8 = arith.constant 15 : i32
    %18 = vector.broadcast %c15_i32_8 : i32 to vector<1x16x16xi32>
    %19 = arith.cmpi slt, %5, %18 : vector<1x16x16xi32>
    %20 = arith.extui %19 : vector<1x16x16xi1> to vector<1x16x16xi32>
    %21 = arith.sitofp %20 : vector<1x16x16xi32> to vector<1x16x16xf32>
    %c1_i32 = arith.constant 1 : i32
    %22 = tpu.dynamic_rotate %1 by %c1_i32 dim 1 : vector<1x16x16xf32>, i32 -> vector<1x16x16xf32>
    %23 = arith.mulf %22, %9 : vector<1x16x16xf32>
    %c15_i32_9 = arith.constant 15 : i32
    %24 = tpu.dynamic_rotate %1 by %c15_i32_9 dim 1 : vector<1x16x16xf32>, i32 -> vector<1x16x16xf32>
    %25 = arith.mulf %24, %13 : vector<1x16x16xf32>
    %26 = arith.maximumf %23, %25 : vector<1x16x16xf32>
    %27 = arith.maximumf %1, %26 : vector<1x16x16xf32>
    %c1_i32_10 = arith.constant 1 : i32
    %28 = tpu.dynamic_rotate %27 by %c1_i32_10 dim 2 : vector<1x16x16xf32>, i32 -> vector<1x16x16xf32>
    %29 = arith.mulf %28, %17 : vector<1x16x16xf32>
    %c15_i32_11 = arith.constant 15 : i32
    %30 = tpu.dynamic_rotate %27 by %c15_i32_11 dim 2 : vector<1x16x16xf32>, i32 -> vector<1x16x16xf32>
    %31 = arith.mulf %30, %21 : vector<1x16x16xf32>
    %32 = arith.maximumf %29, %31 : vector<1x16x16xf32>
    %33 = arith.maximumf %27, %32 : vector<1x16x16xf32>
    %cst = arith.constant 5.000000e-01 : f32
    %34 = vector.broadcast %cst : f32 to vector<1x16x16xf32>
    %35 = arith.cmpf ogt, %33, %34 : vector<1x16x16xf32>
    %36 = arith.extui %35 : vector<1x16x16xi1> to vector<1x16x16xi32>
    %37 = arith.sitofp %36 : vector<1x16x16xi32> to vector<1x16x16xf32>
    %cst_12 = arith.constant 5.000000e-01 : f32
    %38 = vector.broadcast %cst_12 : f32 to vector<1x16x16xf32>
    %39 = arith.mulf %38, %3 : vector<1x16x16xf32>
    %40 = math.tanh %39 : vector<1x16x16xf32>
    %cst_13 = arith.constant 5.000000e+00 : f32
    %41 = vector.broadcast %cst_13 : f32 to vector<1x16x16xf32>
    %42 = arith.mulf %41, %40 : vector<1x16x16xf32>
    %43 = math.exp %42 : vector<1x16x16xf32>
    %cst_14 = arith.constant 148.413162 : f32
    %44 = vector.broadcast %cst_14 : f32 to vector<1x16x16xf32>
    %45 = arith.mulf %43, %44 : vector<1x16x16xf32>
    %46 = arith.mulf %45, %37 : vector<1x16x16xf32>
    %cst_15 = arith.constant dense<0.000000e+00> : vector<1x16xf32>
    %47 = vector.multi_reduction <add>, %46, %cst_15 [2] : vector<1x16x16xf32> to vector<1x16xf32>
    %48 = vector.shape_cast %47 : vector<1x16xf32> to vector<1x16x1xf32>
    %cst_16 = arith.constant dense<0.000000e+00> : vector<1x1xf32>
    %49 = vector.multi_reduction <add>, %48, %cst_16 [1] : vector<1x16x1xf32> to vector<1x1xf32>
    %cst_17 = arith.constant dense<0.000000e+00> : vector<1x16xf32>
    %50 = vector.multi_reduction <add>, %37, %cst_17 [2] : vector<1x16x16xf32> to vector<1x16xf32>
    %51 = vector.shape_cast %50 : vector<1x16xf32> to vector<1x16x1xf32>
    %cst_18 = arith.constant dense<0.000000e+00> : vector<1x1xf32>
    %52 = vector.multi_reduction <add>, %51, %cst_18 [1] : vector<1x16x1xf32> to vector<1x1xf32>
    %53 = tpu.concatenate %49, %52 in 1 : vector<1x1xf32>, vector<1x1xf32> -> vector<1x2xf32>
    %c0_19 = arith.constant 0 : index
    %c0_20 = arith.constant 0 : index
    %c0_21 = arith.constant 0 : index
    %54 = vector.load %arg3[%c0_19, %c0_20, %c0_21] : memref<1x1x2xf32, #tpu.memory_space<vmem>>, vector<1x1x2xf32>
    %55 = vector.shape_cast %54 : vector<1x1x2xf32> to vector<1x2xf32>
    %56 = vector.shape_cast %53 : vector<1x2xf32> to vector<1x1x2xf32>
    tpu.vector_store %arg3[%c0_19, %c0_20, %c0_21], %56 {strides = array<i32>} : memref<1x1x2xf32, #tpu.memory_space<vmem>>, vector<1x1x2xf32>,
    return
  }
  func.func @transform_0(%arg0: i32) -> (i32, i32, i32, i32) {
    %c0_i32 = arith.constant 0 : i32
    %c0_i32_0 = arith.constant 0 : i32
    %c0_i32_1 = arith.constant 0 : i32
    %c0_i32_2 = arith.constant 0 : i32
    return %arg0, %c0_i32, %c0_i32_0, %c0_i32_1 : i32, i32, i32, i32
  }
  func.func @transform_1(%arg0: i32) -> (i32, i32, i32, i32) {
    %c0_i32 = arith.constant 0 : i32
    %c0_i32_0 = arith.constant 0 : i32
    %c0_i32_1 = arith.constant 0 : i32
    %c0_i32_2 = arith.constant 0 : i32
    return %arg0, %c0_i32, %c0_i32_0, %c0_i32_1 : i32, i32, i32, i32
  }
  func.func @transform_2(%arg0: i32) -> (i32, i32, i32) {
    %c0_i32 = arith.constant 0 : i32
    %c0_i32_0 = arith.constant 0 : i32
    %c0_i32_1 = arith.constant 0 : i32
    return %arg0, %c0_i32, %c0_i32_0 : i32, i32, i32
  }
}

</mosaic_0001>

<bundles_post_ra>
// kernel: tpu_custom_call.1
= control target key start
LH: loop header
LB: loop body
LE: loop exit
PB: predicated region body
PF: predicated region fallthrough
CT: control target
= control target key end

     0   :  { %7 = vsyncpa [#allocation3], 0  ;;  %s881_s0 = inlined_call_operand.hbm [shape: f32[2,1,16,16], index: 0, kind: input, shape index: {}]   ;;  %s882_s1 = inlined_call_operand.hbm [shape: f32[2,1,16,16], index: 1, kind: input, shape index: {}]   ;;  %s883_s2 = inlined_call_operand.hbm [shape: f32[2,1,2], index: 2, kind: output, shape index: {}]  }
   0x1   :  { %9 = vsyncpa [#allocation3 + $0x1], 0 }
   0x2   :  { %10 = vsyncpa [#allocation6], 0 }
   0x3   :  { %12 = vsyncpa [#allocation6 + $0x1], 0 }
   0x4   :  { %13 = vsyncpa [#allocation4], 0 }
   0x5   :  { %15 = vsyncpa [#allocation4 + $0x1], 0  ;;  %s692_s9 = smov 0   ;;  %s694_s10 = smov 0  }
   0x6   :  { %s696_s11 = smov 0   ;;  %s698_s12 = smov 0  }
   0x7 LB: > { %s713_s13 = sadd.s32 4294967295, %s667_s12   ;;  %s448_s14 = sadd.s32 4294967294, %s667_s12   ;;  %s667_s12 = sphi %s698_s12, %s894_s12   ;;  %s663_s11 = sphi %s696_s11, %s893_s11   ;;  %s659_s10 = sphi %s694_s10, %s892_s10   ;;  %s655_s9 = sphi %s692_s9, %s891_s9  }
   0x8   : > { %s717_s15 = sadd.s32 1, %s667_s12   ;;  %s28_s16 = sadd.s32 1, %s663_s11 }
   0x9   : > { %s25_s17 = ssub.s32 %s667_s12, %s717_s15  ;;  %p35_p0 = scmp.ne.s32.totalorder %s663_s11, %s659_s10 }
   0xa   : > { %p26_p1 = scmp.eq.s32.totalorder %s25_s17, 0  ;;  %p36_p2 = scmp.eq.s32.totalorder %s667_s12, 0 }
   0xb   : > { %p41_p3 = scmp.ne.s32.totalorder %s659_s10, %s655_s9  ;;  %p42_p4 = scmp.eq.s32.totalorder %s713_s13, 0 }
   0xc   : > { %s729_s18 = scalar_select %p26_p1, %s663_s11, %s28_s16  }
   0xd   : > { %p731_p5 = por %p36_p2, %p35_p0  ;;  %p735_p6 = por %p42_p4, %p41_p3 }
   0xe   : > { %p91_p7 = scmp.eq.s32.totalorder %s713_s13, 1  ;;  %p97_p8 = scmp.eq.s32.totalorder %s448_s14, 1 }
   0xf   : > { %p487_p10 = scmp.lt.s32.totalorder %s667_s12, 2  ;;  %s751_s23 = sand.u32 1, %s663_s11  }
  0x10   : > { %p742_p11 = por %p91_p7, %p35_p0  ;;  %p746_p12 = por %p97_p8, %p41_p3 }
  0x11   : > { %s468_s24 = sshll.u32 %s667_s12, 4  ;;  %s451_s25 = sshll.u32 %s751_s23, 4 }
  0x12   : > { %s126_s28 = scalar_lea.hbm %s881_s0, %s468_s24  ;;  %s121_s30 = scalar_lea.vmem [#allocation2], %s451_s25 }
  0x13   : > { %s127_s29 = sshll.u32 %s126_s28, 4  ;;  %s129_s3 = sshll.u32 %s121_s30, 4  ;;  %s128_s29 = int_to_ptr.hbm [resolvable:$true] %s127_s29  ;;  %s130_s3 = int_to_ptr.vmem [resolvable:$true] %s129_s3 }
  0x14   : > { %p764_p13 = pnand %p487_p10, %p731_p5  ;;  %p457_p0 = scmp.ge.s32.totalorder %s667_s12, 1 }
  0x15   : > { %p159_p1 = scmp.lt.s32.totalorder %s667_s12, 3  ;;  %s118_s5 = scalar_lea.sflag [#allocation3], %s751_s23 }
  0x16   : > { %s537_s6 = sshra.s32 %s128_s29, 4  ;;  %p541_p3 = pneg %p764_p13  ;;  %s538_s6 = int_to_ptr.hbm [resolvable:$true] %s537_s6 }
  0x17   : > { %s539_s7 = scalar_lea.hbm %s538_s6, 16  ;;  %s544_s16 = scalar_lea.hbm %s881_s0, 32 }
  0x18   : > { %p540_p2 = scmp.ne.s32.totalorder %s538_s6, %s539_s7  ;;  %p545_p5 = scmp.lt.s32.totalorder %s538_s6, %s881_s0 }
  0x19   : > { %p546_p8 = scmp.lt.s32.totalorder %s544_s16, %s539_s7 }
  0x1a   : > { %p542_p4 = pnand %p541_p3, %p540_p2 }
  0x1b   : > { %p547_p10 = por %p546_p8, %p545_p5 }
  0x1c   : > { %p543_p7 = pneg %p542_p4 }
  0x1e   : > { %p548_p9 = pnand %p547_p10, %p543_p7 }
  0x20   : > { %551 = shalt.err (!%p548_p9)
}
  0x21   : > { %s669_s26 = smov 128   ;;  %s670_s27 = smov 8  }
  0x22   : > { %479 = dma.hbm_to_vmem [thread:$0]  (!%p764_p13), %s128_s29, 256, %s130_s3, %s118_s5, %s669_s26, %s669_s26, %s670_s27  }
  0x23   : > { %p788_p2 = pnand %p457_p0, %p159_p1  ;;  %s148_s7 = scalar_lea.hbm %s882_s1, %s468_s24 }
  0x24   : > { %s149_s8 = sshll.u32 %s148_s7, 4  ;;  %s143_s14 = scalar_lea.vmem [#allocation5], %s451_s25  ;;  %s150_s8 = int_to_ptr.hbm [resolvable:$true] %s149_s8 }
  0x25   : > { %s151_s16 = sshll.u32 %s143_s14, 4  ;;  %s140_s17 = scalar_lea.sflag [#allocation6], %s751_s23  ;;  %s152_s16 = int_to_ptr.vmem [resolvable:$true] %s151_s16 }
  0x26   : > { %s567_s19 = sshra.s32 %s150_s8, 4  ;;  %s574_s30 = scalar_lea.hbm %s882_s1, 32  ;;  %s568_s19 = int_to_ptr.hbm [resolvable:$true] %s567_s19 }
  0x27   : > { %s569_s29 = scalar_lea.hbm %s568_s19, 16  ;;  %p575_p4 = scmp.lt.s32.totalorder %s568_s19, %s882_s1 }
  0x28   : > { %p570_p9 = scmp.ne.s32.totalorder %s568_s19, %s569_s29  ;;  %p576_p7 = scmp.lt.s32.totalorder %s574_s30, %s569_s29 }
  0x2a   : > { %p572_p0 = pnand %p570_p9, %p541_p3  ;;  %p577_p5 = por %p576_p7, %p575_p4 }
  0x2c   : > { %p573_p1 = pneg %p572_p0 }
  0x2e   : > { %p578_p8 = pnand %p577_p5, %p573_p1 }
  0x30   : > { %581 = shalt.err (!%p578_p8)
}
  0x31   : > { %482 = dma.hbm_to_vmem [thread:$0]  (!%p764_p13), %s150_s8, 256, %s152_s16, %s140_s17, %s669_s26, %s669_s26, %s670_s27  }
  0x32   : > { %163 = sbr.rel (%p788_p2) target bundleno = 693 (0x2b5), region = 28  ;;  %s814_s23 = sand.u32 (!%p788_p2), 1, %s659_s10  }
  0x33   : > { %s458_s25 = sshll.u32 (!%p788_p2), %s814_s23, 4  ;;  %s166_s7 = scalar_lea.sflag (!%p788_p2), [#allocation3], %s814_s23 }
  0x34   : > { %s818_s14 = scalar_lea.vmem (!%p788_p2), [#allocation2], %s458_s25 }
  0x37   : > { %642 = dma.done.wait (%p735_p6), %s166_s7, 256  }
  0x38   : > { %644 = vsyncadd (%p735_p6), %s166_s7, 4294967040  ;;  %s176_s4 = scalar_lea.sflag [#allocation6], %s814_s23  ;;  %s179_s26 = scalar_lea.vmem [#allocation5], %s458_s25 }
  0x39   : > { %646 = dma.done.wait (%p735_p6), %s176_s4, 256  }
  0x3a   : > { %648 = vsyncadd (%p735_p6), %s176_s4, 4294967040  ;;  %v209_v0 = vlaneseq  ;;  %v205_v3 = vld [vmem:[%s179_s26] sm:$0xff]  ;;  %v206_v4 = vld [vmem:[%s179_s26 + $0x8] sm:$0xff]  ;;  %v671_v5 = vmov 0.0   ;;  %s672_s20 = smov 16   ;;  %s673_s27 = smov 1  }
  0x3b   : > { %v232_v7 = vrot.slane %v205_v3, 7  ;;  %v233_v8 = vrot.slane %v206_v4, 7  ;;  %v239_v9 = vrot.slane %v205_v3, 1  ;;  %v240_v10 = vrot.slane %v206_v4, 1  ;;  %s674_s28 = smov 15   ;;  %s675_s8 = smov 14  }
  0x3c   : > { %v210_v1 = vshrl.u32 %v209_v0, 7  ;;  %v213_v22 = vand.u32 127, %v209_v0  ;;  %vm250_vm6 = vcmask 1047680   ;;  %s676_s16 = smov 113   ;;  %v207_v43 = vld [vmem:[%s818_s14] sm:$0xff]  ;;  %v208_v50 = vld [vmem:[%s818_s14 + $0x8] sm:$0xff]  ;;  %s355_s29 = scalar_lea.hbm %s883_s2, %s713_s13 }
  0x3d   : > { %v301_v44 = vmul.f32 0.5, %v207_v43  ;;  %vm315_vm7 = vcmask 130048   ;;  %v302_v53 = vmul.f32 0.5, %v208_v50  ;;  %s204_s3 = scalar_lea.vmem [#allocation7], %s814_s23  ;;  %s359_s30 = sshll.u32 %s355_s29, 4  ;;  %vm342_vm10 = vcmask 7168   ;;  %s360_s30 = int_to_ptr.hbm [resolvable:$true] %s359_s30 }
  0x3e   : > { %vm214_vm0 = vcmp.gt.s32.totalorder %v210_v1, 0  ;;  %v211_v2 = vadd.s32 8, %v210_v1  ;;  %vm234_vm1 = vcmp.lt.s32.totalorder %v210_v1, 1  ;;  %vm241_vm2 = vcmp.lt.s32.totalorder %v210_v1, 7  ;;  %s357_s5 = sshll.u32 %s204_s3, 4  ;;  %s347_s24 = scalar_lea.sflag [#allocation4], %s814_s23  ;;  %s358_s5 = int_to_ptr.vmem [resolvable:$true] %s357_s5 }
  0x3f   : > { %v460_v6 = vsel %vm214_vm0, 1.0, %v671_v5  ;;  %v236_v11 = vsel %vm234_vm1, %v233_v8, %v232_v7  ;;  %v242_v12 = vsel %vm241_vm2, %v239_v9, %v240_v10  ;;  %v243_v14 = vsel %vm241_vm2, %v240_v10, %v239_v9  ;;  %s611_s6 = sshra.s32 %s360_s30, 4  ;;  %s617_s14 = scalar_lea.hbm %s883_s2, 2  ;;  %s612_s6 = int_to_ptr.hbm [resolvable:$true] %s611_s6 }
  0x40   : > { %vm221_vm3 = vcmp.lt.s32.totalorder %v211_v2, 15  ;;  %v237_v15 = vmul.f32 %v460_v6, %v236_v11  ;;  %v235_v18 = vsel %vm234_vm1, %v232_v7, %v233_v8  ;;  %vm229_vm4 = vcmp.lt.s32.totalorder %v213_v22, 15  ;;  %s613_s25 = scalar_lea.hbm %s612_s6, 1  ;;  %p618_p10 = scmp.lt.s32.totalorder %s612_s6, %s883_s2 }
  0x41   : > { %v461_v13 = vsel %vm221_vm3, 1.0, %v671_v5  ;;  %v463_v23 = vsel %vm229_vm4, 1.0, %v671_v5  ;;  %vm226_vm5 = vcmp.gt.s32.totalorder %v213_v22, 0  ;;  %529 = vtanh.f32 %v301_v44  ;;  %p614_p6 = scmp.ne.s32.totalorder %s612_s6, %s613_s25  ;;  %p619_p2 = scmp.lt.s32.totalorder %s617_s14, %s613_s25 }
  0x42   : > { %v246_v16 = vmax.f32 %v237_v15, %v242_v12  ;;  %v245_v17 = vmul.f32 %v461_v13, %v243_v14  ;;  %270 = vrot.lane.b32.xlu2 %v463_v23, %s673_s27  ;;  %v462_v24 = vsel %vm226_vm5, 1.0, %v671_v5  ;;  %vm344_vm11 = vcmask 8192  }
  0x43   : > { %p615_p13 = pnand %p614_p6, %p742_p11  ;;  %p620_p9 = por %p619_p2, %p618_p10 }
  0x44   : > { %v248_v19 = vmax.f32 %v205_v3, %v246_v16  ;;  %v247_v20 = vmax.f32 %v235_v18, %v245_v17 }
  0x45   : > { %p616_p3 = pneg %p615_p13 }
  0x46   : > { %251 = vrot.lane.b32.xlu0 %v248_v19, %s672_s20  ;;  %v831_v21 = vmax.f32 %v206_v4, %v247_v20 }
  0x47   : > { %v530_v45 = vpop.eup %529  ;;  %p621_p0 = pnand %p620_p9, %p616_p3 }
  0x48   : > { %v305_v46 = vmul.f32 5.0, %v530_v45 }
  0x4a   : > { %264 = vrot.lane.b32.xlu2 %v462_v24, %s674_s28  ;;  %v307_v47 = vmul.f32 1.442695, %v305_v46 }
  0x4c   : > { %531 = vpow2.f32 %v307_v47 }
  0x4d   : > { %533 = vtanh.f32 %v302_v53 }
  0x4e   : > { %254 = vrot.lane.b32.xlu0 %v831_v21, %s672_s20 }
  0x52   : > { %v532_v48 = vpop.eup %531 }
  0x53   : > { %v311_v52 = vmul.f32 148.41316, %v532_v48  ;;  %v534_v58 = vpop.eup %533 }
  0x54   : > { %v306_v59 = vmul.f32 5.0, %v534_v58 }
  0x56   : > { %v309_v60 = vmul.f32 1.442695, %v306_v59 }
  0x58   : > { %535 = vpow2.f32 %v309_v60 }
  0x5e   : > { %v536_v61 = vpop.eup %535 }
  0x5f   : > { %v312_v0 = vmul.f32 148.41316, %v536_v61 }
  0x9c   : > { %v271_v30 = vpop.permute.xlu2 %270 }
  0xa4   : > { %v265_v36 = vpop.permute.xlu2 %264 }
  0xb8   : > { %v252_v25 = vpop.permute.xlu0 %251 }
  0xb9   : > { %v253_v26 = vsel %vm250_vm6, %v252_v25, %v248_v19 }
  0xba   : > { %257 = vrot.lane.b32.xlu1 %v253_v26, %s672_s20 }
  0xc0   : > { %v255_v27 = vpop.permute.xlu0 %254 }
  0xc1   : > { %v256_v28 = vsel %vm250_vm6, %v255_v27, %v831_v21 }
  0xc2   : > { %259 = vrot.lane.b32.xlu1 %v256_v28, %s672_s20 }
 0x12c   : > { %v258_v29 = vpop.permute.xlu1 %257 }
 0x12d   : > { %v261_v31 = vsel %vm250_vm6, %v258_v29, %v248_v19 }
 0x12e   : > { %v273_v32 = vmul.f32 %v271_v30, %v261_v31  ;;  %v267_v37 = vmul.f32 %v265_v36, %v261_v31 }
 0x130   : > { %277 = vrot.lane.b32.xlu0 %v273_v32, %s675_s8 }
 0x134   : > { %v260_v33 = vpop.permute.xlu1 %259 }
 0x135   : > { %v262_v34 = vsel %vm250_vm6, %v260_v33, %v831_v21 }
 0x136   : > { %v274_v35 = vmul.f32 %v271_v30, %v262_v34  ;;  %v268_v40 = vmul.f32 %v265_v36, %v262_v34 }
 0x138   : > { %279 = vrot.lane.b32.xlu1 %v274_v35, %s675_s8 }
 0x1a2   : > { %v278_v38 = vpop.permute.xlu0 %277 }
 0x1a3   : > { %v283_v39 = vmax.f32 %v267_v37, %v278_v38 }
 0x1a5   : > { %287 = vrot.lane.b32.xlu2 %v283_v39, %s676_s16 }
 0x1aa   : > { %v280_v41 = vpop.permute.xlu1 %279 }
 0x1ab   : > { %v284_v42 = vmax.f32 %v268_v40, %v280_v41 }
 0x1ad   : > { %289 = vrot.lane.b32.xlu0 %v284_v42, %s676_s16 }
 0x1ff   : > { %v288_v49 = vpop.permute.xlu2 %287 }
 0x200   : > { %v293_v51 = vmax.f32 %v248_v19, %v288_v49 }
 0x202   : > { %vm295_vm8 = vcmp.gt.f32.partialorder %v293_v51, 0.5 }
 0x203   : > { %v464_v54 = vsel %vm295_vm8, 1.0, %v671_v5 }
 0x204   : > { %v329_v55 = vsel %vm315_vm7, %v464_v54, 0.0  ;;  %v313_v56 = vmul.f32 %v464_v54, %v311_v52 }
 0x205   : > { %330 = vadd.xlane.f32.xlu0 %v329_v55 }
 0x206   : > { %v316_v57 = vsel %vm315_vm7, %v313_v56, 0.0 }
 0x207   : > { %317 = vadd.xlane.f32.xlu1 %v316_v57 }
 0x21f   : > { %v290_v62 = vpop.permute.xlu0 %289 }
 0x220   : > { %v294_v63 = vmax.f32 %v831_v21, %v290_v62 }
 0x222   : > { %vm296_vm9 = vcmp.gt.f32.partialorder %v294_v63, 0.5 }
 0x223   : > { %v465_v1 = vsel %vm296_vm9, 1.0, %v671_v5 }
 0x224   : > { %v314_v2 = vmul.f32 %v465_v1, %v312_v0  ;;  %v332_v4 = vsel %vm315_vm7, %v465_v1, 0.0 }
 0x226   : > { %v319_v3 = vsel %vm315_vm7, %v314_v2, 0.0 }
 0x227   : > { %320 = vadd.xlane.f32.xlu2 %v319_v3 }
 0x22f   : > { %333 = vadd.xlane.f32.xlu2 %v332_v4 }
 0x278   : > { %v331_v11 = vpop.xlane.xlu0 %330 }
 0x27a   : > { %v318_v6 = vpop.xlane.xlu1 %317 }
 0x29a   : > { %v321_v7 = vpop.xlane.xlu2 %320 }
 0x29b   : > { %v322_v8 = vadd.f32 %v321_v7, %v318_v6 }
 0x29d   : > { %v323_v9 = vrot.slane %v322_v8, 4 }
 0x29f   : > { %v324_v10 = vadd.f32 %v323_v9, %v322_v8 }
 0x2a1   : > { %v325_v13 = vrot.slane %v324_v10, 2 }
 0x2a2   : > { %v334_v12 = vpop.xlane.xlu2 %333 }
 0x2a3   : > { %v335_v14 = vadd.f32 %v334_v12, %v331_v11  ;;  %v326_v5 = vadd.f32 %v325_v13, %v324_v10 }
 0x2a5   : > { %v336_v15 = vrot.slane %v335_v14, 4  ;;  %v327_v18 = vrot.slane %v326_v5, 1 }
 0x2a7   : > { %v337_v16 = vadd.f32 %v336_v15, %v335_v14  ;;  %v328_v21 = vadd.f32 %v327_v18, %v326_v5 }
 0x2a9   : > { %v338_v17 = vrot.slane %v337_v16, 2 }
 0x2ab   : > { %v339_v19 = vadd.f32 %v338_v17, %v337_v16 }
 0x2ad   : > { %v340_v20 = vrot.slane %v339_v19, 1 }
 0x2af   : > { %v341_v22 = vadd.f32 %v340_v20, %v339_v19 }
 0x2b1   : > { %v343_v23 = vsel %vm342_vm10, %v328_v21, %v341_v22 }
 0x2b2   : > { %345 = vst.msk [vmem:[%s204_s3] sm:$0x1] %vm344_vm11, %v343_v23 }
 0x2b3   : > { %624 = shalt.err (!%p621_p0)
}
 0x2b4   : > { %474 = dma.vmem_to_hbm [thread:$0]  (%p742_p11), %s358_s5, 16, %s360_s30, %s347_s24  }
 0x2b5 PF: > { %s371_s23 = sand.u32 1, %s655_s9   ;;  %p890_p1 = scmp.ge.s32.totalorder %s667_s12, 2 }
 0x2b6   : > { %s372_s20 = scalar_lea.sflag [#allocation4], %s371_s23 }
 0x2b7   : > { %p484_p4 = pnand %p890_p1, %p746_p12 }
 0x2b9   : > { %p485_p7 = pneg %p484_p4 }
 0x2bb   : > { %650 = dma.done.wait (%p485_p7), %s372_s20, 16  }
 0x2bc   : > { %652 = vsyncadd (%p485_p7), %s372_s20, 4294967280  ;;  %p18_p5 = scmp.ge.s32.totalorder %s717_s15, 4   ;;  %s891_s9 = smov %s659_s10 }
 0x2bd   : > { %s892_s10 = smov %s663_s11  ;;  %s893_s11 = smov %s729_s18 }
 0x2be   : > { %s894_s12 = smov %s717_s15  ;;  %20 = sbr.rel (!%p18_p5) target bundleno = 7 (0x7), region = 86 }
 0x2c3   :  { %377 = vsyncpa [#allocation3], 1 }
 0x2c4   :  { %379 = vsyncpa [#allocation3 + $0x1], 1 }
 0x2c5   :  { %380 = vsyncpa [#allocation6], 1 }
 0x2c6   :  { %382 = vsyncpa [#allocation6 + $0x1], 1 }
 0x2c7   :  { %383 = vsyncpa [#allocation4], 1 }
 0x2c8   :  { %385 = vsyncpa [#allocation4 + $0x1], 1 }

</bundles_post_ra>
